<compile_context>
chip_gen: v7x
topology: tpu7x:2x2x1
jax: 0.10.0
libtpu: 0.0.40
codegen_flags: <defaults>
</compile_context>

<pallas_src>
import functools

import jax
import jax.numpy as jnp
from jax.experimental import pallas as pl
from jax.experimental.pallas import tpu as pltpu

BINS = 64
MAX_SIZE = 40
_N_CHUNK = 256          # samples (lanes) per inner step: (bins, 256) f32 = 16 vregs
_MAX_BATCH_TILE = 4     # batch rows per grid step (bounds unroll + VMEM)


def _fast_recip(u):
    # EUP approximate reciprocal (own VLIW slot) + one Newton step -> ~f32
    # accuracy.  The Newton step costs 3 VALU ops/element; removing it
    # (~2^-12 rel. error) is a measured experiment, kept for the 1e-5 check.
    r = pl.reciprocal(u, approx=True)
    return r * (2.0 - u * r)


def _hist_kernel(lin_ref, x_ref, o_ref, *, scale, n_chunk):
    # lin_ref : (bins, 1)     f32 -- bin centers, already multiplied by `scale`
    # x_ref   : (bb, C, N)    f32 -- samples, lane-dense along N
    # o_ref   : (bb, bins, C) f32 -- per-(batch, channel) histograms as columns
    bb, nch, n = x_ref.shape
    bins = lin_ref.shape[0]

    lin_s = lin_ref[...]                                   # (bins, 1)
    chunk_starts = list(range(0, n, n_chunk))              # static slices only

    for b in range(bb):                                    # bb <= 4, static
        for c in range(nch):                               # C small & static
            acc = jnp.zeros((bins, 1), jnp.float32)
            for n0 in chunk_starts:
                nc = min(n_chunk, n - n0)
                # (1, nc) row; scale is applied on the narrow row, not the slab.
                xs = x_ref[b, c:c + 1, n0:n0 + nc] * scale
                # sublane-broadcast xs, lane-broadcast lin_s -> (bins, nc)
                d = xs - lin_s
                w = _fast_recip(1.0 + d * d)               # EUP + VALU
                acc = acc + jnp.sum(w, axis=1, keepdims=True)   # exact f32, XLU
            den = jnp.sum(acc)                             # exact normalizer
            o_ref[b, :, c:c + 1] = acc / den


def _batch_tile(batch):
    """Largest divisor of `batch` <= _MAX_BATCH_TILE that still leaves >= 2
    grid steps (both v7x TensorCores busy) and >= 4 steps when possible
    (DMA/compute pipelining)."""
    best = 1
    for d in range(1, min(_MAX_BATCH_TILE, batch) + 1):
        if batch % d == 0 and batch // d >= min(4, batch):
            best = d
    return best


def hist_block_channel(x, value_range, sigma=0.002, bins=BINS,
                       max_size=MAX_SIZE, sampling="interpolation"):
    """x: (B, C, H, W). value_range: (lo, hi). Returns (B, C, bins) float32."""
    B, C, H, W = x.shape
    if H > max_size or W > max_size:
        if sampling == "interpolation":
            # F.interpolate(mode='bilinear', align_corners=False) equivalent.
            x = jax.image.resize(x, (B, C, max_size, max_size),
                                 method="bilinear", antialias=False)
            H = W = max_size
        else:
            # TODO(synk): 'sampling' (index_select) downsample mode not implemented.
            raise NotImplementedError("only 'interpolation' sampling is supported")

    N = H * W
    lo, hi = float(value_range[0]), float(value_range[1])
    scale = 1.0 / (sigma * (hi - lo + 1.0))

    # True torch.linspace bin centers, pre-scaled once (256 B input).
    lin_s = (jnp.linspace(lo, hi, bins, dtype=jnp.float32)
             * jnp.float32(scale)).reshape(bins, 1)

    # torch's x.reshape(B, -1, C, 1) row-major reinterpretation, then a
    # wrapper-side transpose so N is lane-dense inside the kernel.
    x3 = jnp.transpose(x.reshape(B, N, C).astype(jnp.float32), (0, 2, 1))  # (B,C,N)

    bb = _batch_tile(B)
    n_chunk = min(_N_CHUNK, N)
    kernel = functools.partial(_hist_kernel, scale=scale, n_chunk=n_chunk)

    cost = pl.CostEstimate(
        flops=7 * B * C * N * bins,
        transcendentals=B * C * N * bins,
        bytes_accessed=int(x3.size) * 4 + bins * 4 + B * bins * C * 4,
    )

    out = pl.pallas_call(
        kernel,
        out_shape=jax.ShapeDtypeStruct((B, bins, C), jnp.float32),
        grid=(B // bb,),
        in_specs=[
            pl.BlockSpec((bins, 1), lambda i: (0, 0)),       # bin centers
            pl.BlockSpec((bb, C, N), lambda i: (i, 0, 0)),   # lane-dense samples
        ],
        out_specs=pl.BlockSpec((bb, bins, C), lambda i: (i, 0, 0)),
        compiler_params=pltpu.CompilerParams(
            dimension_semantics=("parallel",)),
        cost_estimate=cost,
    )(lin_s, x3)

    # (B, bins, C) -> (B, C, bins): tiny XLA transpose outside the kernel.
    return jnp.transpose(out, (0, 2, 1))


def _reference(x, value_range, sigma=0.002, bins=BINS, max_size=MAX_SIZE):
    """Pure-JAX transcription of the PyTorch forward (true linspace centers)."""
    B, C, H, W = x.shape
    if H > max_size or W > max_size:
        x = jax.image.resize(x, (B, C, max_size, max_size), method="bilinear",
                             antialias=False)
    lo, hi = float(value_range[0]), float(value_range[1])
    lin = jnp.linspace(lo, hi, bins, dtype=jnp.float32).reshape(1, 1, 1, bins)
    xr = x.astype(jnp.float32).reshape(B, -1, C, 1)
    d = (xr - lin) ** 2 / (sigma * (hi - lo + 1.0)) ** 2
    d = 1.0 / (1.0 + d)
    his = d.sum(axis=1)
    return his / his.sum(axis=2, keepdims=True)


if __name__ == "__main__":
    key = jax.random.PRNGKey(0)
    B, C, H, W = 2, 4, 16, 16          # small shapes consistent with the module
    x = jax.random.uniform(key, (B, C, H, W), dtype=jnp.float32)
    value_range = (0.0, 1.0)

    out = hist_block_channel(x, value_range, sigma=0.002)
    out = jax.block_until_ready(out)

    ref = _reference(x, value_range, sigma=0.002)
    assert out.shape == (B, C, BINS)
    assert bool(jnp.allclose(out, ref, atol=1e-5, rtol=1e-5)), "mismatch vs reference"

    print("KERNEL_OK")
</pallas_src>

<mosaic_0001>
module attributes {stable_mosaic.version = 11 : i64} {
  func.func @_hist_kernel(%arg0: i32, %arg1: memref<64x1xf32, #tpu.memory_space<vmem>>, %arg2: memref<1x4x256xf32, #tpu.memory_space<vmem>>, %arg3: memref<1x64x4xf32, #tpu.memory_space<vmem>>) attributes {dimension_semantics = [#tpu.dimension_semantics<parallel>], iteration_bounds = array<i64: 2>, scalar_prefetch = 0 : i64, scratch_operands = 0 : i64, tpu.core_type = #tpu.core_type<tc>, window_params = [{pipeline_mode = #tpu.pipeline_mode<synchronous>, transform_indices = @transform_0, window_bounds = array<i64: 64, 1>}, {transform_indices = @transform_1, window_bounds = array<i64: 1, 4, 256>}, {transform_indices = @transform_2, window_bounds = array<i64: 1, 64, 4>}]} {
    %c0 = arith.constant 0 : index
    %c0_0 = arith.constant 0 : index
    %0 = vector.load %arg1[%c0, %c0_0] : memref<64x1xf32, #tpu.memory_space<vmem>>, vector<64x1xf32>
    %cst = arith.constant 0.000000e+00 : f32
    %1 = vector.broadcast %cst : f32 to vector<64x1xf32>
    %c0_1 = arith.constant 0 : index
    %c0_2 = arith.constant 0 : index
    %c0_3 = arith.constant 0 : index
    %2 = vector.load %arg2[%c0_1, %c0_2, %c0_3] : memref<1x4x256xf32, #tpu.memory_space<vmem>>, vector<1x1x256xf32>
    %3 = vector.shape_cast %2 : vector<1x1x256xf32> to vector<1x256xf32>
    %cst_4 = arith.constant 2.500000e+02 : f32
    %4 = vector.broadcast %cst_4 : f32 to vector<1x256xf32>
    %5 = arith.mulf %3, %4 : vector<1x256xf32>
    %6 = vector.broadcast %5 : vector<1x256xf32> to vector<64x256xf32>
    %7 = vector.broadcast %0 : vector<64x1xf32> to vector<64x256xf32>
    %8 = arith.subf %6, %7 : vector<64x256xf32>
    %9 = arith.mulf %8, %8 : vector<64x256xf32>
    %cst_5 = arith.constant 1.000000e+00 : f32
    %10 = vector.broadcast %cst_5 : f32 to vector<64x256xf32>
    %11 = arith.addf %10, %9 : vector<64x256xf32>
    %12 = tpu.reciprocal %11 {approx = true} : vector<64x256xf32> -> vector<64x256xf32>
    %13 = arith.mulf %11, %12 : vector<64x256xf32>
    %cst_6 = arith.constant 2.000000e+00 : f32
    %14 = vector.broadcast %cst_6 : f32 to vector<64x256xf32>
    %15 = arith.subf %14, %13 : vector<64x256xf32>
    %16 = arith.mulf %12, %15 : vector<64x256xf32>
    %cst_7 = arith.constant dense<0.000000e+00> : vector<64xf32>
    %17 = vector.multi_reduction <add>, %16, %cst_7 [1] : vector<64x256xf32> to vector<64xf32>
    %18 = vector.shape_cast %17 : vector<64xf32> to vector<64x1xf32>
    %19 = arith.addf %1, %18 : vector<64x1xf32>
    %20 = vector.shape_cast %19 : vector<64x1xf32> to vector<1x64x1xf32>
    %cst_8 = arith.constant dense<0.000000e+00> : vector<1xf32>
    %21 = vector.multi_reduction <add>, %20, %cst_8 [1, 2] : vector<1x64x1xf32> to vector<1xf32>
    %22 = vector.shape_cast %21 : vector<1xf32> to vector<1x1x1xf32>
    %23 = vector.extract %22[0, 0, 0] : f32 from vector<1x1x1xf32>
    %24 = vector.broadcast %23 : f32 to vector<64x1xf32>
    %25 = arith.divf %19, %24 : vector<64x1xf32>
    %c0_9 = arith.constant 0 : index
    %c0_10 = arith.constant 0 : index
    %c0_11 = arith.constant 0 : index
    %26 = vector.load %arg3[%c0_9, %c0_10, %c0_11] : memref<1x64x4xf32, #tpu.memory_space<vmem>>, vector<1x64x1xf32>
    %27 = vector.shape_cast %26 : vector<1x64x1xf32> to vector<64x1xf32>
    %28 = vector.shape_cast %25 : vector<64x1xf32> to vector<1x64x1xf32>
    tpu.vector_store %arg3[%c0_9, %c0_10, %c0_11], %28 {strides = array<i32>} : memref<1x64x4xf32, #tpu.memory_space<vmem>>, vector<1x64x1xf32>,
    %cst_12 = arith.constant 0.000000e+00 : f32
    %29 = vector.broadcast %cst_12 : f32 to vector<64x1xf32>
    %c0_13 = arith.constant 0 : index
    %c1 = arith.constant 1 : index
    %c0_14 = arith.constant 0 : index
    %30 = vector.load %arg2[%c0_13, %c1, %c0_14] : memref<1x4x256xf32, #tpu.memory_space<vmem>>, vector<1x1x256xf32>
    %31 = vector.shape_cast %30 : vector<1x1x256xf32> to vector<1x256xf32>
    %cst_15 = arith.constant 2.500000e+02 : f32
    %32 = vector.broadcast %cst_15 : f32 to vector<1x256xf32>
    %33 = arith.mulf %31, %32 : vector<1x256xf32>
    %34 = vector.broadcast %33 : vector<1x256xf32> to vector<64x256xf32>
    %35 = vector.broadcast %0 : vector<64x1xf32> to vector<64x256xf32>
    %36 = arith.subf %34, %35 : vector<64x256xf32>
    %37 = arith.mulf %36, %36 : vector<64x256xf32>
    %cst_16 = arith.constant 1.000000e+00 : f32
    %38 = vector.broadcast %cst_16 : f32 to vector<64x256xf32>
    %39 = arith.addf %38, %37 : vector<64x256xf32>
    %40 = tpu.reciprocal %39 {approx = true} : vector<64x256xf32> -> vector<64x256xf32>
    %41 = arith.mulf %39, %40 : vector<64x256xf32>
    %cst_17 = arith.constant 2.000000e+00 : f32
    %42 = vector.broadcast %cst_17 : f32 to vector<64x256xf32>
    %43 = arith.subf %42, %41 : vector<64x256xf32>
    %44 = arith.mulf %40, %43 : vector<64x256xf32>
    %cst_18 = arith.constant dense<0.000000e+00> : vector<64xf32>
    %45 = vector.multi_reduction <add>, %44, %cst_18 [1] : vector<64x256xf32> to vector<64xf32>
    %46 = vector.shape_cast %45 : vector<64xf32> to vector<64x1xf32>
    %47 = arith.addf %29, %46 : vector<64x1xf32>
    %48 = vector.shape_cast %47 : vector<64x1xf32> to vector<1x64x1xf32>
    %cst_19 = arith.constant dense<0.000000e+00> : vector<1xf32>
    %49 = vector.multi_reduction <add>, %48, %cst_19 [1, 2] : vector<1x64x1xf32> to vector<1xf32>
    %50 = vector.shape_cast %49 : vector<1xf32> to vector<1x1x1xf32>
    %51 = vector.extract %50[0, 0, 0] : f32 from vector<1x1x1xf32>
    %52 = vector.broadcast %51 : f32 to vector<64x1xf32>
    %53 = arith.divf %47, %52 : vector<64x1xf32>
    %c0_20 = arith.constant 0 : index
    %c0_21 = arith.constant 0 : index
    %c1_22 = arith.constant 1 : index
    %54 = vector.load %arg3[%c0_20, %c0_21, %c1_22] : memref<1x64x4xf32, #tpu.memory_space<vmem>>, vector<1x64x1xf32>
    %55 = vector.shape_cast %54 : vector<1x64x1xf32> to vector<64x1xf32>
    %56 = vector.shape_cast %53 : vector<64x1xf32> to vector<1x64x1xf32>
    tpu.vector_store %arg3[%c0_20, %c0_21, %c1_22], %56 {strides = array<i32>} : memref<1x64x4xf32, #tpu.memory_space<vmem>>, vector<1x64x1xf32>,
    %cst_23 = arith.constant 0.000000e+00 : f32
    %57 = vector.broadcast %cst_23 : f32 to vector<64x1xf32>
    %c0_24 = arith.constant 0 : index
    %c2 = arith.constant 2 : index
    %c0_25 = arith.constant 0 : index
    %58 = vector.load %arg2[%c0_24, %c2, %c0_25] : memref<1x4x256xf32, #tpu.memory_space<vmem>>, vector<1x1x256xf32>
    %59 = vector.shape_cast %58 : vector<1x1x256xf32> to vector<1x256xf32>
    %cst_26 = arith.constant 2.500000e+02 : f32
    %60 = vector.broadcast %cst_26 : f32 to vector<1x256xf32>
    %61 = arith.mulf %59, %60 : vector<1x256xf32>
    %62 = vector.broadcast %61 : vector<1x256xf32> to vector<64x256xf32>
    %63 = vector.broadcast %0 : vector<64x1xf32> to vector<64x256xf32>
    %64 = arith.subf %62, %63 : vector<64x256xf32>
    %65 = arith.mulf %64, %64 : vector<64x256xf32>
    %cst_27 = arith.constant 1.000000e+00 : f32
    %66 = vector.broadcast %cst_27 : f32 to vector<64x256xf32>
    %67 = arith.addf %66, %65 : vector<64x256xf32>
    %68 = tpu.reciprocal %67 {approx = true} : vector<64x256xf32> -> vector<64x256xf32>
    %69 = arith.mulf %67, %68 : vector<64x256xf32>
    %cst_28 = arith.constant 2.000000e+00 : f32
    %70 = vector.broadcast %cst_28 : f32 to vector<64x256xf32>
    %71 = arith.subf %70, %69 : vector<64x256xf32>
    %72 = arith.mulf %68, %71 : vector<64x256xf32>
    %cst_29 = arith.constant dense<0.000000e+00> : vector<64xf32>
    %73 = vector.multi_reduction <add>, %72, %cst_29 [1] : vector<64x256xf32> to vector<64xf32>
    %74 = vector.shape_cast %73 : vector<64xf32> to vector<64x1xf32>
    %75 = arith.addf %57, %74 : vector<64x1xf32>
    %76 = vector.shape_cast %75 : vector<64x1xf32> to vector<1x64x1xf32>
    %cst_30 = arith.constant dense<0.000000e+00> : vector<1xf32>
    %77 = vector.multi_reduction <add>, %76, %cst_30 [1, 2] : vector<1x64x1xf32> to vector<1xf32>
    %78 = vector.shape_cast %77 : vector<1xf32> to vector<1x1x1xf32>
    %79 = vector.extract %78[0, 0, 0] : f32 from vector<1x1x1xf32>
    %80 = vector.broadcast %79 : f32 to vector<64x1xf32>
    %81 = arith.divf %75, %80 : vector<64x1xf32>
    %c0_31 = arith.constant 0 : index
    %c0_32 = arith.constant 0 : index
    %c2_33 = arith.constant 2 : index
    %82 = vector.load %arg3[%c0_31, %c0_32, %c2_33] : memref<1x64x4xf32, #tpu.memory_space<vmem>>, vector<1x64x1xf32>
    %83 = vector.shape_cast %82 : vector<1x64x1xf32> to vector<64x1xf32>
    %84 = vector.shape_cast %81 : vector<64x1xf32> to vector<1x64x1xf32>
    tpu.vector_store %arg3[%c0_31, %c0_32, %c2_33], %84 {strides = array<i32>} : memref<1x64x4xf32, #tpu.memory_space<vmem>>, vector<1x64x1xf32>,
    %cst_34 = arith.constant 0.000000e+00 : f32
    %85 = vector.broadcast %cst_34 : f32 to vector<64x1xf32>
    %c0_35 = arith.constant 0 : index
    %c3 = arith.constant 3 : index
    %c0_36 = arith.constant 0 : index
    %86 = vector.load %arg2[%c0_35, %c3, %c0_36] : memref<1x4x256xf32, #tpu.memory_space<vmem>>, vector<1x1x256xf32>
    %87 = vector.shape_cast %86 : vector<1x1x256xf32> to vector<1x256xf32>
    %cst_37 = arith.constant 2.500000e+02 : f32
    %88 = vector.broadcast %cst_37 : f32 to vector<1x256xf32>
    %89 = arith.mulf %87, %88 : vector<1x256xf32>
    %90 = vector.broadcast %89 : vector<1x256xf32> to vector<64x256xf32>
    %91 = vector.broadcast %0 : vector<64x1xf32> to vector<64x256xf32>
    %92 = arith.subf %90, %91 : vector<64x256xf32>
    %93 = arith.mulf %92, %92 : vector<64x256xf32>
    %cst_38 = arith.constant 1.000000e+00 : f32
    %94 = vector.broadcast %cst_38 : f32 to vector<64x256xf32>
    %95 = arith.addf %94, %93 : vector<64x256xf32>
    %96 = tpu.reciprocal %95 {approx = true} : vector<64x256xf32> -> vector<64x256xf32>
    %97 = arith.mulf %95, %96 : vector<64x256xf32>
    %cst_39 = arith.constant 2.000000e+00 : f32
    %98 = vector.broadcast %cst_39 : f32 to vector<64x256xf32>
    %99 = arith.subf %98, %97 : vector<64x256xf32>
    %100 = arith.mulf %96, %99 : vector<64x256xf32>
    %cst_40 = arith.constant dense<0.000000e+00> : vector<64xf32>
    %101 = vector.multi_reduction <add>, %100, %cst_40 [1] : vector<64x256xf32> to vector<64xf32>
    %102 = vector.shape_cast %101 : vector<64xf32> to vector<64x1xf32>
    %103 = arith.addf %85, %102 : vector<64x1xf32>
    %104 = vector.shape_cast %103 : vector<64x1xf32> to vector<1x64x1xf32>
    %cst_41 = arith.constant dense<0.000000e+00> : vector<1xf32>
    %105 = vector.multi_reduction <add>, %104, %cst_41 [1, 2] : vector<1x64x1xf32> to vector<1xf32>
    %106 = vector.shape_cast %105 : vector<1xf32> to vector<1x1x1xf32>
    %107 = vector.extract %106[0, 0, 0] : f32 from vector<1x1x1xf32>
    %108 = vector.broadcast %107 : f32 to vector<64x1xf32>
    %109 = arith.divf %103, %108 : vector<64x1xf32>
    %c0_42 = arith.constant 0 : index
    %c0_43 = arith.constant 0 : index
    %c3_44 = arith.constant 3 : index
    %110 = vector.load %arg3[%c0_42, %c0_43, %c3_44] : memref<1x64x4xf32, #tpu.memory_space<vmem>>, vector<1x64x1xf32>
    %111 = vector.shape_cast %110 : vector<1x64x1xf32> to vector<64x1xf32>
    %112 = vector.shape_cast %109 : vector<64x1xf32> to vector<1x64x1xf32>
    tpu.vector_store %arg3[%c0_42, %c0_43, %c3_44], %112 {strides = array<i32>} : memref<1x64x4xf32, #tpu.memory_space<vmem>>, vector<1x64x1xf32>,
    return
  }
  func.func @transform_0(%arg0: i32) -> (i32, i32) {
    %c0_i32 = arith.constant 0 : i32
    %c0_i32_0 = arith.constant 0 : i32
    %c0_i32_1 = arith.constant 0 : i32
    return %c0_i32, %c0_i32_0 : i32, i32
  }
  func.func @transform_1(%arg0: i32) -> (i32, i32, i32) {
    %c0_i32 = arith.constant 0 : i32
    %c0_i32_0 = arith.constant 0 : i32
    %c0_i32_1 = arith.constant 0 : i32
    return %arg0, %c0_i32, %c0_i32_0 : i32, i32, i32
  }
  func.func @transform_2(%arg0: i32) -> (i32, i32, i32) {
    %c0_i32 = arith.constant 0 : i32
    %c0_i32_0 = arith.constant 0 : i32
    %c0_i32_1 = arith.constant 0 : i32
    return %arg0, %c0_i32, %c0_i32_0 : i32, i32, i32
  }
}

</mosaic_0001>

<bundles_post_ra>
// kernel: tpu_custom_call.1
= control target key start
LH: loop header
LB: loop body
LE: loop exit
PB: predicated region body
PF: predicated region fallthrough
CT: control target
= control target key end

     0   :  { %s1245_s9 = smov 0   ;;  %s1822_s0 = inlined_call_operand.vmem [shape: f32[64,1], index: 0, kind: input, shape index: {}]   ;;  %s1823_s1 = inlined_call_operand.vmem [shape: f32[2,4,256], index: 1, kind: input, shape index: {}]   ;;  %s1824_s2 = inlined_call_operand.vmem [shape: f32[2,64,4], index: 2, kind: output, shape index: {}]  }
   0x1 LB: > { %s1050_s10 = sadd.s32 4294967295, %s1227_s9   ;;  %p1054_p0 = scmp.ge.s32.totalorder %s1227_s9, 1  ;;  %s1227_s9 = sphi %s1245_s9, %s12_s9  }
   0x2   : > { %p112_p1 = scmp.lt.s32.totalorder %s1227_s9, 3 }
   0x4   : > { %p113_p2 = pnand %p1054_p0, %p112_p1 }
   0x5   : > { %v146_v0 = vld [vmem:[%s1822_s0 + $0x10] sm:$0xff] (!%p113_p2)  ;;  %v144_v1 = vld [vmem:[%s1822_s0] sm:$0xff] (!%p113_p2)  ;;  %v1229_v2 = vmov (!%p113_p2), 0   ;;  %v147_v3 = vld [vmem:[%s1822_s0 + $0x18] sm:$0xff] (!%p113_p2)  ;;  %p134_p3 = scmp.lt.s32.totalorder (!%p113_p2), %s1050_s10, 1  ;;  %v155_v9 = vlaneseq (!%p113_p2)  ;;  %vm349_vm0 = vcmask (!%p113_p2), 7168  }
   0x6   : > { %116 = sbr.rel (%p113_p2) target bundleno = 637 (0x27d), region = 28  ;;  %1084 = vset.pattern.permute.xlu1 (!%p113_p2), %v1229_v2  ;;  %1083 = vset.pattern.permute.xlu0 (!%p113_p2), %v1229_v2  ;;  %v145_v4 = vld [vmem:[%s1822_s0 + $0x8] sm:$0xff] (!%p113_p2)  ;;  %v148_v6 = vld [vmem:[%s1822_s0 + $0x20] sm:$0xff] (!%p113_p2)  ;;  %v151_v7 = vld [vmem:[%s1822_s0 + $0x38] sm:$0xff] (!%p113_p2)  ;;  %vm584_vm1 = vcmask (!%p113_p2), 15368   ;;  %vm785_vm2 = vcmask (!%p113_p2), 23568  }
   0x7   : > { %177 = vperm.xlu1 (!%p113_p2), %1084, %v146_v0   ;;  %167 = vperm.xlu0 (!%p113_p2), %1083, %v144_v1   ;;  %v149_v5 = vld [vmem:[%s1822_s0 + $0x28] sm:$0xff] (!%p113_p2)  ;;  %v150_v8 = vld [vmem:[%s1822_s0 + $0x30] sm:$0xff] (!%p113_p2)  ;;  %v156_v10 = vshrl.u32 (!%p113_p2), %v155_v9, 7  ;;  %vm986_vm3 = vcmask (!%p113_p2), 31768  }
   0x9   : > { %v157_v14 = vsub.s32 (!%p113_p2), 0, %v156_v10  ;;  %v161_v16 = vsub.s32 (!%p113_p2), 1, %v156_v10 }
   0xb   : > { %182 = vperm.xlu1 (!%p113_p2), %1084, %v147_v3   ;;  %172 = vperm.xlu0 (!%p113_p2), %1083, %v145_v4  }
   0xd   : > { %s1826_s10 = smov (!%p134_p3, %s1050_s10), 1 }
   0xe   : > { %s1064_s27 = sshll.u32 %s1826_s10, 3  ;;  %s1065_s5 = sshll.u32 %s1826_s10, 6 }
   0xf   : > { %192 = vperm.xlu1 %1084, %v149_v5   ;;  %187 = vperm.xlu0 %1083, %v148_v6   ;;  %s138_s30 = scalar_lea.vmem %s1823_s1, %s1064_s27  ;;  %s1721_s8 = scalar_lea.vmem %s1824_s2, %s1065_s5 }
  0x10   : > { %v152_v11 = vld [vmem:[%s138_s30] ss:$4 sm:$0x3]  ;;  %v1059_v12 = vld [vmem:[%s138_s30 + $0x1] ss:$4 sm:$0x3] }
  0x11   : > { %v1060_v13 = vld [vmem:[%s138_s30 + $0x2] ss:$4 sm:$0x3]  ;;  %v153_v15 = vmul.f32 250.0, %v152_v11  ;;  %v394_v17 = vmul.f32 250.0, %v1059_v12 }
  0x12   : > { %v1061_v18 = vld [vmem:[%s138_s30 + $0x3] ss:$4 sm:$0x3]  ;;  %v595_v19 = vmul.f32 250.0, %v1060_v13 }
  0x13   : > { %202 = vperm.xlu1 %1084, %v151_v7   ;;  %197 = vperm.xlu0 %1083, %v150_v8   ;;  %v796_v20 = vmul.f32 250.0, %v1061_v18  ;;  %v1283_v21 = vrot.slane %v153_v15, %v157_v14  ;;  %v1285_v22 = vrot.slane %v153_v15, %v161_v16  ;;  %v1287_v23 = vrot.slane %v394_v17, %v157_v14 }
  0x14   : > { %v1289_v24 = vrot.slane %v394_v17, %v161_v16  ;;  %v1291_v25 = vrot.slane %v595_v19, %v157_v14  ;;  %v1293_v26 = vrot.slane %v595_v19, %v161_v16 }
  0x15   : > { %v1297_v29 = vrot.slane %v796_v20, %v157_v14  ;;  %v1299_v30 = vrot.slane %v796_v20, %v161_v16 }
  0x86   : > { %v1295_v27 = vpop.permute.xlu1 %177  ;;  %v168_v28 = vpop.permute.xlu0 %167 }
  0x87   : > { %v205_v31 = vsub.f32 %v1283_v21, %v168_v28  ;;  %v206_v32 = vsub.f32 %v1285_v22, %v168_v28  ;;  %v406_v33 = vsub.f32 %v1287_v23, %v168_v28  ;;  %v407_v34 = vsub.f32 %v1289_v24, %v168_v28 }
  0x88   : > { %v209_v35 = vsub.f32 %v1283_v21, %v1295_v27  ;;  %v210_v36 = vsub.f32 %v1285_v22, %v1295_v27  ;;  %v607_v37 = vsub.f32 %v1291_v25, %v168_v28  ;;  %v608_v38 = vsub.f32 %v1293_v26, %v168_v28 }
  0x89   : > { %v221_v39 = vmul.f32 %v205_v31, %v205_v31  ;;  %v222_v40 = vmul.f32 %v206_v32, %v206_v32  ;;  %v422_v41 = vmul.f32 %v406_v33, %v406_v33  ;;  %v423_v42 = vmul.f32 %v407_v34, %v407_v34 }
  0x8a   : > { %v1311_v43 = vpop.permute.xlu0 %172  ;;  %v225_v44 = vmul.f32 %v209_v35, %v209_v35  ;;  %v226_v45 = vmul.f32 %v210_v36, %v210_v36  ;;  %v623_v46 = vmul.f32 %v607_v37, %v607_v37  ;;  %v624_v47 = vmul.f32 %v608_v38, %v608_v38  ;;  %v1334_v4 = vpop.permute.xlu1 %182 }
  0x8b   : > { %v237_v48 = vadd.f32 1.0, %v221_v39  ;;  %v238_v49 = vadd.f32 1.0, %v222_v40  ;;  %v207_v50 = vsub.f32 %v1283_v21, %v1311_v43  ;;  %v208_v51 = vsub.f32 %v1285_v22, %v1311_v43 }
  0x8c   : > { %v438_v52 = vadd.f32 1.0, %v422_v41  ;;  %v1317_v53 = vadd.f32 1.0, %v423_v42  ;;  %v1319_v54 = vadd.f32 1.0, %v225_v44  ;;  %v1321_v55 = vadd.f32 1.0, %v226_v45 }
  0x8d   : > { %1085 = vrcp.f32 %v237_v48  ;;  %v223_v56 = vmul.f32 %v207_v50, %v207_v50  ;;  %v224_v57 = vmul.f32 %v208_v51, %v208_v51  ;;  %v408_v58 = vsub.f32 %v1287_v23, %v1311_v43 }
  0x8e   : > { %1087 = vrcp.f32 %v238_v49  ;;  %v409_v59 = vsub.f32 %v1289_v24, %v1311_v43  ;;  %v609_v60 = vsub.f32 %v1291_v25, %v1311_v43  ;;  %v610_v61 = vsub.f32 %v1293_v26, %v1311_v43 }
  0x8f   : > { %v239_v62 = vadd.f32 1.0, %v223_v56  ;;  %v1331_v63 = vadd.f32 1.0, %v224_v57  ;;  %1089 = vrcp.f32 %v438_v52  ;;  %v424_v0 = vmul.f32 %v408_v58, %v408_v58 }
  0x90   : > { %1091 = vrcp.f32 %v1317_v53  ;;  %v425_v1 = vmul.f32 %v409_v59, %v409_v59  ;;  %v625_v2 = vmul.f32 %v609_v60, %v609_v60  ;;  %v626_v3 = vmul.f32 %v610_v61, %v610_v61 }
  0x91   : > { %1093 = vrcp.f32 %v239_v62  ;;  %v1336_v5 = vadd.f32 1.0, %v424_v0  ;;  %v1338_v6 = vadd.f32 1.0, %v623_v46  ;;  %v1340_v7 = vadd.f32 1.0, %v624_v47 }
  0x92   : > { %1095 = vrcp.f32 %v1331_v63  ;;  %v1343_v8 = vadd.f32 1.0, %v425_v1  ;;  %v1345_v9 = vadd.f32 1.0, %v625_v2  ;;  %v1347_v10 = vadd.f32 1.0, %v626_v3 }
  0x93   : > { %1097 = vrcp.f32 %v1319_v54  ;;  %v808_v11 = vsub.f32 %v1297_v29, %v168_v28  ;;  %v809_v12 = vsub.f32 %v1299_v30, %v168_v28  ;;  %v410_v13 = vsub.f32 %v1287_v23, %v1295_v27 }
  0x94   : > { %1099 = vrcp.f32 %v1321_v55  ;;  %v411_v14 = vsub.f32 %v1289_v24, %v1295_v27  ;;  %v211_v15 = vsub.f32 %v1283_v21, %v1334_v4  ;;  %v212_v16 = vsub.f32 %v1285_v22, %v1334_v4 }
  0x95   : > { %1101 = vrcp.f32 %v1336_v5  ;;  %v824_v17 = vmul.f32 %v808_v11, %v808_v11  ;;  %v825_v18 = vmul.f32 %v809_v12, %v809_v12  ;;  %v426_v19 = vmul.f32 %v410_v13, %v410_v13 }
  0x96   : > { %1103 = vrcp.f32 %v1343_v8  ;;  %v427_v20 = vmul.f32 %v411_v14, %v411_v14  ;;  %v227_v28 = vmul.f32 %v211_v15, %v211_v15  ;;  %v228_v31 = vmul.f32 %v212_v16, %v212_v16 }
  0x97   : > { %v1086_v32 = vpop.eup %1085  ;;  %1105 = vrcp.f32 %v1345_v9  ;;  %v1364_v33 = vadd.f32 1.0, %v824_v17  ;;  %v1366_v34 = vadd.f32 1.0, %v825_v18  ;;  %v1368_v35 = vadd.f32 1.0, %v426_v19 }
  0x98   : > { %v1088_v36 = vpop.eup %1087  ;;  %v269_v37 = vmul.f32 %v1086_v32, %v237_v48  ;;  %1107 = vrcp.f32 %v1347_v10  ;;  %v1371_v38 = vadd.f32 1.0, %v427_v20  ;;  %v1373_v39 = vadd.f32 1.0, %v227_v28 }
  0x99   : > { %v1090_v40 = vpop.eup %1089  ;;  %v270_v41 = vmul.f32 %v1088_v36, %v238_v49  ;;  %1109 = vrcp.f32 %v1338_v6  ;;  %v1376_v42 = vadd.f32 1.0, %v228_v31  ;;  %v810_v44 = vsub.f32 %v1297_v29, %v1311_v43 }
  0x9a   : > { %v1092_v45 = vpop.eup %1091  ;;  %v285_v46 = vsub.f32 2.0, %v269_v37  ;;  %v470_v47 = vmul.f32 %v1090_v40, %v438_v52  ;;  %1111 = vrcp.f32 %v1340_v7  ;;  %v811_v48 = vsub.f32 %v1299_v30, %v1311_v43 }
  0x9b   : > { %v1094_v50 = vpop.eup %1093  ;;  %v286_v51 = vsub.f32 2.0, %v270_v41  ;;  %v471_v56 = vmul.f32 %v1092_v45, %v1317_v53  ;;  %1113 = vrcp.f32 %v1364_v33  ;;  %v826_v49 = vmul.f32 %v810_v44, %v810_v44 }
  0x9c   : > { %v1096_v57 = vpop.eup %1095  ;;  %v301_v58 = vmul.f32 %v1086_v32, %v285_v46  ;;  %v271_v59 = vmul.f32 %v1094_v50, %v239_v62  ;;  %v486_v60 = vsub.f32 2.0, %v470_v47  ;;  %1115 = vrcp.f32 %v1366_v34 }
  0x9d   : > { %v1098_v61 = vpop.eup %1097  ;;  %v302_v52 = vmul.f32 %v1088_v36, %v286_v51  ;;  %v272_v0 = vmul.f32 %v1096_v57, %v1331_v63  ;;  %v487_v1 = vsub.f32 2.0, %v471_v56  ;;  %1117 = vrcp.f32 %v1368_v35 }
  0x9e   : > { %v1100_v43 = vpop.eup %1099  ;;  %v287_v2 = vsub.f32 2.0, %v271_v59  ;;  %v502_v3 = vmul.f32 %v1090_v40, %v486_v60  ;;  %v273_v53 = vmul.f32 %v1098_v61, %v1319_v54  ;;  %1119 = vrcp.f32 %v1371_v38 }
  0x9f   : > { %v1102_v11 = vpop.eup %1101  ;;  %v317_v12 = vadd.f32 %v302_v52, %v301_v58  ;;  %v288_v62 = vsub.f32 2.0, %v272_v0  ;;  %v503_v13 = vmul.f32 %v1092_v45, %v487_v1  ;;  %v274_v14 = vmul.f32 %v1100_v43, %v1321_v55 }
  0xa0   : > { %v1104_v15 = vpop.eup %1103  ;;  %v303_v16 = vmul.f32 %v1094_v50, %v287_v2  ;;  %v289_v17 = vsub.f32 2.0, %v273_v53  ;;  %v472_v63 = vmul.f32 %v1102_v11, %v1336_v5  ;;  %1121 = vrcp.f32 %v1373_v39 }
  0xa1   : > { %v1106_v18 = vpop.eup %1105  ;;  %318 = vadd.xlane.f32.xlu0 %v317_v12  ;;  %v304_v19 = vmul.f32 %v1096_v57, %v288_v62  ;;  %v518_v20 = vadd.f32 %v503_v13, %v502_v3  ;;  %v290_v54 = vsub.f32 2.0, %v274_v14  ;;  %v473_v28 = vmul.f32 %v1104_v15, %v1343_v8 }
  0xa2   : > { %v1108_v31 = vpop.eup %1107  ;;  %v305_v32 = vmul.f32 %v1098_v61, %v289_v17  ;;  %v488_v36 = vsub.f32 2.0, %v472_v63  ;;  %v673_v37 = vmul.f32 %v1106_v18, %v1345_v9  ;;  %1123 = vrcp.f32 %v1376_v42 }
  0xa3   : > { %v1110_v55 = vpop.eup %1109  ;;  %v320_v40 = vadd.f32 %v304_v19, %v303_v16  ;;  %v306_v41 = vmul.f32 %v1100_v43, %v290_v54  ;;  %v489_v5 = vsub.f32 2.0, %v473_v28  ;;  %v674_v44 = vmul.f32 %v1108_v31, %v1347_v10  ;;  %v1411_v19 = vpop.permute.xlu0 %187 }
  0xa4   : > { %v1112_v45 = vpop.eup %1111  ;;  %v504_v46 = vmul.f32 %v1102_v11, %v488_v36  ;;  %v689_v47 = vsub.f32 2.0, %v673_v37  ;;  %v671_v50 = vmul.f32 %v1110_v55, %v1338_v6  ;;  %v827_v51 = vmul.f32 %v811_v48, %v811_v48 }
  0xa5   : > { %v1114_v8 = vpop.eup %1113  ;;  %321 = vadd.xlane.f32.xlu1 %v320_v40  ;;  %519 = vadd.xlane.f32.xlu0 %v518_v20  ;;  %v323_v56 = vadd.f32 %v306_v41, %v305_v32  ;;  %v505_v57 = vmul.f32 %v1104_v15, %v489_v5  ;;  %v690_v9 = vsub.f32 2.0, %v674_v44  ;;  %v672_v58 = vmul.f32 %v1112_v45, %v1340_v7 }
  0xa6   : > { %v1116_v59 = vpop.eup %1115  ;;  %v705_v60 = vmul.f32 %v1106_v18, %v689_v47  ;;  %v687_v61 = vsub.f32 2.0, %v671_v50  ;;  %v872_v52 = vmul.f32 %v1114_v8, %v1364_v33  ;;  %v1400_v10 = vadd.f32 1.0, %v826_v49 }
  0xa7   : > { %v1118_v0 = vpop.eup %1117  ;;  %v521_v1 = vadd.f32 %v505_v57, %v504_v46  ;;  %v706_v43 = vmul.f32 %v1108_v31, %v690_v9  ;;  %v688_v6 = vsub.f32 2.0, %v672_v58  ;;  %v873_v48 = vmul.f32 %v1116_v59, %v1366_v34 }
  0xa8   : > { %v1120_v2 = vpop.eup %1119  ;;  %v703_v3 = vmul.f32 %v1110_v55, %v687_v61  ;;  %v888_v53 = vsub.f32 2.0, %v872_v52  ;;  %v474_v11 = vmul.f32 %v1118_v0, %v1368_v35  ;;  %v1404_v12 = vadd.f32 1.0, %v827_v51 }
  0xa9   : > { %324 = vadd.xlane.f32.xlu1 %v323_v56  ;;  %522 = vadd.xlane.f32.xlu0 %v521_v1  ;;  %v722_v7 = vadd.f32 %v706_v43, %v705_v60  ;;  %v704_v62 = vmul.f32 %v1112_v45, %v688_v6  ;;  %v889_v33 = vsub.f32 2.0, %v873_v48  ;;  %v475_v49 = vmul.f32 %v1120_v2, %v1371_v38 }
  0xaa   : > { %v1122_v13 = vpop.eup %1121  ;;  %v904_v14 = vmul.f32 %v1114_v8, %v888_v53  ;;  %v490_v15 = vsub.f32 2.0, %v474_v11  ;;  %1125 = vrcp.f32 %v1400_v10  ;;  %v412_v34 = vsub.f32 %v1287_v23, %v1334_v4 }
  0xab   : > { %v719_v16 = vadd.f32 %v704_v62, %v703_v3  ;;  %v905_v17 = vmul.f32 %v1116_v59, %v889_v33  ;;  %v491_v35 = vsub.f32 2.0, %v475_v49  ;;  %v275_v63 = vmul.f32 %v1122_v13, %v1373_v39 }
  0xac   : > { %v1124_v18 = vpop.eup %1123  ;;  %v506_v20 = vmul.f32 %v1118_v0, %v490_v15  ;;  %1127 = vrcp.f32 %v1404_v12  ;;  %v413_v38 = vsub.f32 %v1289_v24, %v1334_v4  ;;  %v428_v54 = vmul.f32 %v412_v34, %v412_v34 }
  0xad   : > { %723 = vadd.xlane.f32.xlu1 %v722_v7  ;;  %720 = vadd.xlane.f32.xlu0 %v719_v16  ;;  %v920_v28 = vadd.f32 %v905_v17, %v904_v14  ;;  %v507_v31 = vmul.f32 %v1120_v2, %v491_v35  ;;  %v276_v32 = vmul.f32 %v1124_v18, %v1376_v42  ;;  %v291_v36 = vsub.f32 2.0, %v275_v63  ;;  %v1442_v7 = vpop.permute.xlu1 %192 }
  0xae   : > { %v429_v37 = vmul.f32 %v413_v38, %v413_v38  ;;  %v444_v55 = vadd.f32 1.0, %v428_v54  ;;  %v611_v39 = vsub.f32 %v1291_v25, %v1295_v27  ;;  %v612_v40 = vsub.f32 %v1293_v26, %v1295_v27 }
  0xaf   : > { %v524_v41 = vadd.f32 %v507_v31, %v506_v20  ;;  %v292_v5 = vsub.f32 2.0, %v276_v32  ;;  %v307_v44 = vmul.f32 %v1122_v13, %v291_v36  ;;  %v213_v45 = vsub.f32 %v1283_v21, %v1411_v19 }
  0xb0   : > { %v445_v46 = vadd.f32 1.0, %v429_v37  ;;  %1129 = vrcp.f32 %v444_v55  ;;  %v627_v47 = vmul.f32 %v611_v39, %v611_v39  ;;  %v628_v50 = vmul.f32 %v612_v40, %v612_v40 }
  0xb1   : > { %921 = vadd.xlane.f32.xlu1 %v920_v28  ;;  %525 = vadd.xlane.f32.xlu0 %v524_v41  ;;  %v308_v42 = vmul.f32 %v1124_v18, %v292_v5  ;;  %v214_v51 = vsub.f32 %v1285_v22, %v1411_v19  ;;  %v229_v8 = vmul.f32 %v213_v45, %v213_v45 }
  0xb2   : > { %1131 = vrcp.f32 %v445_v46  ;;  %v643_v56 = vadd.f32 1.0, %v627_v47  ;;  %v1425_v57 = vadd.f32 1.0, %v628_v50  ;;  %v812_v9 = vsub.f32 %v1297_v29, %v1295_v27 }
  0xb3   : > { %v326_v58 = vadd.f32 %v308_v42, %v307_v44  ;;  %v230_v59 = vmul.f32 %v214_v51, %v214_v51  ;;  %v1429_v60 = vadd.f32 1.0, %v229_v8  ;;  %v813_v61 = vsub.f32 %v1299_v30, %v1295_v27 }
  0xb4   : > { %v1126_v52 = vpop.eup %1125  ;;  %1133 = vrcp.f32 %v643_v56  ;;  %v828_v0 = vmul.f32 %v812_v9, %v812_v9  ;;  %v414_v1 = vsub.f32 %v1287_v23, %v1411_v19  ;;  %v415_v43 = vsub.f32 %v1289_v24, %v1411_v19 }
  0xb5   : > { %327 = vadd.xlane.f32.xlu1 %v326_v58  ;;  %v874_v6 = vmul.f32 %v1126_v52, %v1400_v10  ;;  %1135 = vrcp.f32 %v1425_v57  ;;  %v246_v48 = vadd.f32 1.0, %v230_v59  ;;  %v829_v2 = vmul.f32 %v813_v61, %v813_v61 }
  0xb6   : > { %v1128_v3 = vpop.eup %1127  ;;  %1137 = vrcp.f32 %v1429_v60  ;;  %v1440_v27 = vadd.f32 1.0, %v828_v0  ;;  %v430_v53 = vmul.f32 %v414_v1, %v414_v1  ;;  %v431_v11 = vmul.f32 %v415_v43, %v415_v43 }
  0xb7   : > { %v875_v62 = vmul.f32 %v1128_v3, %v1404_v12  ;;  %v890_v33 = vsub.f32 2.0, %v874_v6  ;;  %1139 = vrcp.f32 %v246_v48  ;;  %v845_v49 = vadd.f32 1.0, %v829_v2 }
  0xb8   : > { %1141 = vrcp.f32 %v1440_v27  ;;  %v1446_v10 = vadd.f32 1.0, %v430_v53  ;;  %v1448_v13 = vadd.f32 1.0, %v431_v11  ;;  %v613_v14 = vsub.f32 %v1291_v25, %v1334_v4 }
  0xb9   : > { %v891_v15 = vsub.f32 2.0, %v875_v62  ;;  %v906_v34 = vmul.f32 %v1126_v52, %v890_v33  ;;  %1143 = vrcp.f32 %v845_v49  ;;  %v614_v16 = vsub.f32 %v1293_v26, %v1334_v4 }
  0xba   : > { %v1130_v17 = vpop.eup %1129  ;;  %1145 = vrcp.f32 %v1446_v10  ;;  %v629_v12 = vmul.f32 %v613_v14, %v613_v14  ;;  %v215_v35 = vsub.f32 %v1283_v21, %v1442_v7  ;;  %v216_v63 = vsub.f32 %v1285_v22, %v1442_v7 }
  0xbb   : > { %v907_v18 = vmul.f32 %v1128_v3, %v891_v15  ;;  %v476_v20 = vmul.f32 %v1130_v17, %v444_v55  ;;  %1147 = vrcp.f32 %v1448_v13  ;;  %v630_v38 = vmul.f32 %v614_v16, %v614_v16 }
  0xbc   : > { %v1132_v54 = vpop.eup %1131  ;;  %v1460_v28 = vadd.f32 1.0, %v629_v12  ;;  %v231_v31 = vmul.f32 %v215_v35, %v215_v35  ;;  %v232_v32 = vmul.f32 %v216_v63, %v216_v63  ;;  %v814_v36 = vsub.f32 %v1297_v29, %v1334_v4 }
  0xbd   : > { %v923_v37 = vadd.f32 %v907_v18, %v906_v34  ;;  %v477_v39 = vmul.f32 %v1132_v54, %v445_v46  ;;  %v492_v40 = vsub.f32 2.0, %v476_v20  ;;  %v1464_v41 = vadd.f32 1.0, %v630_v38 }
  0xbe   : > { %v1134_v5 = vpop.eup %1133  ;;  %1149 = vrcp.f32 %v1460_v28  ;;  %v1467_v55 = vadd.f32 1.0, %v231_v31  ;;  %v1469_v44 = vadd.f32 1.0, %v232_v32  ;;  %v815_v45 = vsub.f32 %v1299_v30, %v1334_v4 }
  0xbf   : > { %v1136_v47 = vpop.eup %1135  ;;  %924 = vadd.xlane.f32.xlu0 %v923_v37  ;;  %v493_v50 = vsub.f32 2.0, %v477_v39  ;;  %v508_v42 = vmul.f32 %v1130_v17, %v492_v40  ;;  %v675_v51 = vmul.f32 %v1134_v5, %v643_v56  ;;  %1151 = vrcp.f32 %v1464_v41 }
  0xc0   : > { %v1138_v46 = vpop.eup %1137  ;;  %v676_v8 = vmul.f32 %v1136_v47, %v1425_v57  ;;  %1153 = vrcp.f32 %v1467_v55  ;;  %v830_v9 = vmul.f32 %v814_v36, %v814_v36  ;;  %v831_v58 = vmul.f32 %v815_v45, %v815_v45 }
  0xc1   : > { %v1140_v59 = vpop.eup %1139  ;;  %v509_v61 = vmul.f32 %v1132_v54, %v493_v50  ;;  %v691_v52 = vsub.f32 2.0, %v675_v51  ;;  %v277_v0 = vmul.f32 %v1138_v46, %v1429_v60  ;;  %1155 = vrcp.f32 %v1469_v44 }
  0xc2   : > { %v1142_v4 = vpop.eup %1141  ;;  %v692_v1 = vsub.f32 2.0, %v676_v8  ;;  %v278_v43 = vmul.f32 %v1140_v59, %v246_v48  ;;  %v1478_v56 = vadd.f32 1.0, %v830_v9  ;;  %v1480_v6 = vadd.f32 1.0, %v831_v58 }
  0xc3   : > { %v1144_v2 = vpop.eup %1143  ;;  %v527_v57 = vadd.f32 %v509_v61, %v508_v42  ;;  %v707_v3 = vmul.f32 %v1134_v5, %v691_v52  ;;  %v293_v53 = vsub.f32 2.0, %v277_v0  ;;  %v876_v11 = vmul.f32 %v1142_v4, %v1440_v27 }
  0xc4   : > { %v1146_v62 = vpop.eup %1145  ;;  %v708_v33 = vmul.f32 %v1136_v47, %v692_v1  ;;  %v294_v14 = vsub.f32 2.0, %v278_v43  ;;  %v877_v15 = vmul.f32 %v1144_v2, %v845_v49  ;;  %1157 = vrcp.f32 %v1478_v56 }
  0xc5   : > { %v1148_v60 = vpop.eup %1147  ;;  %528 = vadd.xlane.f32.xlu1 %v527_v57  ;;  %v309_v34 = vmul.f32 %v1138_v46, %v293_v53  ;;  %v892_v48 = vsub.f32 2.0, %v876_v11  ;;  %v478_v16 = vmul.f32 %v1146_v62, %v1446_v10  ;;  %1159 = vrcp.f32 %v1480_v6 }
  0xc6   : > { %v725_v17 = vadd.f32 %v708_v33, %v707_v3  ;;  %v310_v12 = vmul.f32 %v1140_v59, %v294_v14  ;;  %v893_v35 = vsub.f32 2.0, %v877_v15  ;;  %v479_v63 = vmul.f32 %v1148_v60, %v1448_v13  ;;  %v1500_v59 = vpop.permute.xlu0 %197 }
  0xc7   : > { %v908_v27 = vmul.f32 %v1142_v4, %v892_v48  ;;  %v494_v18 = vsub.f32 2.0, %v478_v16  ;;  %v416_v49 = vsub.f32 %v1287_v23, %v1442_v7  ;;  %v417_v20 = vsub.f32 %v1289_v24, %v1442_v7 }
  0xc8   : > { %v1150_v38 = vpop.eup %1149  ;;  %726 = vadd.xlane.f32.xlu0 %v725_v17  ;;  %v329_v54 = vadd.f32 %v310_v12, %v309_v34  ;;  %v909_v31 = vmul.f32 %v1144_v2, %v893_v35  ;;  %v495_v10 = vsub.f32 2.0, %v479_v63  ;;  %v615_v32 = vsub.f32 %v1291_v25, %v1411_v19 }
  0xc9   : > { %v1152_v36 = vpop.eup %1151  ;;  %v510_v37 = vmul.f32 %v1146_v62, %v494_v18  ;;  %v677_v13 = vmul.f32 %v1150_v38, %v1460_v28  ;;  %v432_v39 = vmul.f32 %v416_v49, %v416_v49  ;;  %v433_v40 = vmul.f32 %v417_v20, %v417_v20 }
  0xca   : > { %v1154_v5 = vpop.eup %1153  ;;  %330 = vadd.xlane.f32.xlu1 %v329_v54  ;;  %v926_v45 = vadd.f32 %v909_v31, %v908_v27  ;;  %v511_v47 = vmul.f32 %v1148_v60, %v495_v10  ;;  %v678_v50 = vmul.f32 %v1152_v36, %v1464_v41  ;;  %v616_v42 = vsub.f32 %v1293_v26, %v1411_v19  ;;  %v1518_v54 = vpop.permute.xlu1 %202 }
  0xcb   : > { %v1156_v51 = vpop.eup %1155  ;;  %v693_v46 = vsub.f32 2.0, %v677_v13  ;;  %v279_v8 = vmul.f32 %v1154_v5, %v1467_v55  ;;  %v448_v9 = vadd.f32 1.0, %v432_v39  ;;  %v1498_v58 = vadd.f32 1.0, %v433_v40 }
  0xcc   : > { %927 = vadd.xlane.f32.xlu0 %v926_v45  ;;  %v530_v28 = vadd.f32 %v511_v47, %v510_v37  ;;  %v694_v61 = vsub.f32 2.0, %v678_v50  ;;  %v280_v52 = vmul.f32 %v1156_v51, %v1469_v44  ;;  %v631_v0 = vmul.f32 %v615_v32, %v615_v32 }
  0xcd   : > { %v709_v4 = vmul.f32 %v1150_v38, %v693_v46  ;;  %v295_v41 = vsub.f32 2.0, %v279_v8  ;;  %1161 = vrcp.f32 %v448_v9  ;;  %v632_v1 = vmul.f32 %v616_v42, %v616_v42 }
  0xce   : > { %v1158_v43 = vpop.eup %1157  ;;  %531 = vadd.xlane.f32.xlu1 %v530_v28  ;;  %v710_v2 = vmul.f32 %v1152_v36, %v694_v61  ;;  %v296_v57 = vsub.f32 2.0, %v280_v52  ;;  %1163 = vrcp.f32 %v1498_v58  ;;  %v647_v55 = vadd.f32 1.0, %v631_v0 }
  0xcf   : > { %v1160_v3 = vpop.eup %1159  ;;  %v311_v53 = vmul.f32 %v1154_v5, %v295_v41  ;;  %v878_v11 = vmul.f32 %v1158_v43, %v1478_v56  ;;  %v648_v62 = vadd.f32 1.0, %v632_v1  ;;  %v217_v44 = vsub.f32 %v1283_v21, %v1500_v59 }
  0xd0   : > { %v728_v33 = vadd.f32 %v710_v2, %v709_v4  ;;  %v312_v14 = vmul.f32 %v1156_v51, %v296_v57  ;;  %v879_v15 = vmul.f32 %v1160_v3, %v1480_v6  ;;  %1165 = vrcp.f32 %v647_v55 }
  0xd1   : > { %v894_v60 = vsub.f32 2.0, %v878_v11  ;;  %1167 = vrcp.f32 %v648_v62  ;;  %v218_v34 = vsub.f32 %v1285_v22, %v1500_v59  ;;  %v233_v48 = vmul.f32 %v217_v44, %v217_v44 }
  0xd2   : > { %729 = vadd.xlane.f32.xlu0 %v728_v33  ;;  %v332_v16 = vadd.f32 %v312_v14, %v311_v53  ;;  %v895_v17 = vsub.f32 2.0, %v879_v15  ;;  %v816_v56 = vsub.f32 %v1297_v29, %v1411_v19  ;;  %v817_v12 = vsub.f32 %v1299_v30, %v1411_v19 }
  0xd3   : > { %v910_v35 = vmul.f32 %v1158_v43, %v894_v60  ;;  %v234_v63 = vmul.f32 %v218_v34, %v218_v34  ;;  %v249_v27 = vadd.f32 1.0, %v233_v48  ;;  %v418_v6 = vsub.f32 %v1287_v23, %v1500_v59 }
  0xd4   : > { %333 = vadd.xlane.f32.xlu1 %v332_v16  ;;  %v911_v18 = vmul.f32 %v1160_v3, %v895_v17  ;;  %v832_v49 = vmul.f32 %v816_v56, %v816_v56  ;;  %v833_v20 = vmul.f32 %v817_v12, %v817_v12  ;;  %v419_v38 = vsub.f32 %v1289_v24, %v1500_v59 }
  0xd5   : > { %v250_v31 = vadd.f32 1.0, %v234_v63  ;;  %1169 = vrcp.f32 %v249_v27  ;;  %v434_v10 = vmul.f32 %v418_v6, %v418_v6  ;;  %v617_v19 = vsub.f32 %v1291_v25, %v1442_v7 }
  0xd6   : > { %v929_v32 = vadd.f32 %v911_v18, %v910_v35  ;;  %v848_v36 = vadd.f32 1.0, %v832_v49  ;;  %v1522_v37 = vadd.f32 1.0, %v833_v20  ;;  %v435_v13 = vmul.f32 %v419_v38, %v419_v38 }
  0xd7   : > { %v1162_v39 = vpop.eup %1161  ;;  %1171 = vrcp.f32 %v250_v31  ;;  %v1524_v40 = vadd.f32 1.0, %v434_v10  ;;  %v618_v5 = vsub.f32 %v1293_v26, %v1442_v7  ;;  %v633_v45 = vmul.f32 %v617_v19, %v617_v19 }
  0xd8   : > { %v1164_v47 = vpop.eup %1163  ;;  %930 = vadd.xlane.f32.xlu0 %v929_v32  ;;  %v480_v50 = vmul.f32 %v1162_v39, %v448_v9  ;;  %1173 = vrcp.f32 %v848_v36  ;;  %v1528_v42 = vadd.f32 1.0, %v435_v13  ;;  %v219_v51 = vsub.f32 %v1283_v21, %v1518_v54 }
  0xd9   : > { %v481_v46 = vmul.f32 %v1164_v47, %v1498_v58  ;;  %1175 = vrcp.f32 %v1522_v37  ;;  %v634_v8 = vmul.f32 %v618_v5, %v618_v5  ;;  %v1534_v28 = vadd.f32 1.0, %v633_v45 }
  0xda   : > { %v1166_v61 = vpop.eup %1165  ;;  %v496_v52 = vsub.f32 2.0, %v480_v50  ;;  %1177 = vrcp.f32 %v1524_v40  ;;  %v220_v9 = vsub.f32 %v1285_v22, %v1518_v54  ;;  %v235_v0 = vmul.f32 %v219_v51, %v219_v51 }
  0xdb   : > { %v1168_v4 = vpop.eup %1167  ;;  %v497_v41 = vsub.f32 2.0, %v481_v46  ;;  %v679_v1 = vmul.f32 %v1166_v61, %v647_v55  ;;  %1179 = vrcp.f32 %v1528_v42  ;;  %v650_v21 = vadd.f32 1.0, %v634_v8 }
  0xdc   : > { %v512_v58 = vmul.f32 %v1162_v39, %v496_v52  ;;  %v680_v43 = vmul.f32 %v1168_v4, %v648_v62  ;;  %1181 = vrcp.f32 %v1534_v28  ;;  %v236_v2 = vmul.f32 %v220_v9, %v220_v9 }
  0xdd   : > { %v513_v57 = vmul.f32 %v1164_v47, %v497_v41  ;;  %v695_v3 = vsub.f32 2.0, %v679_v1  ;;  %1183 = vrcp.f32 %v650_v21  ;;  %v1541_v53 = vadd.f32 1.0, %v235_v0 }
  0xde   : > { %v696_v11 = vsub.f32 2.0, %v680_v43  ;;  %v1543_v44 = vadd.f32 1.0, %v236_v2  ;;  %v818_v22 = vsub.f32 %v1297_v29, %v1442_v7  ;;  %v819_v55 = vsub.f32 %v1299_v30, %v1442_v7 }
  0xdf   : > { %v1170_v33 = vpop.eup %1169  ;;  %v533_v14 = vadd.f32 %v513_v57, %v512_v58  ;;  %v711_v62 = vmul.f32 %v1166_v61, %v695_v3  ;;  %1185 = vrcp.f32 %v1541_v53  ;;  %v420_v15 = vsub.f32 %v1287_v23, %v1518_v54 }
  0xe0   : > { %v712_v60 = vmul.f32 %v1168_v4, %v696_v11  ;;  %v281_v34 = vmul.f32 %v1170_v33, %v249_v27  ;;  %1187 = vrcp.f32 %v1543_v44  ;;  %v834_v48 = vmul.f32 %v818_v22, %v818_v22 }
  0xe1   : > { %v1172_v16 = vpop.eup %1171  ;;  %534 = vadd.xlane.f32.xlu1 %v533_v14  ;;  %v835_v17 = vmul.f32 %v819_v55, %v819_v55  ;;  %v421_v56 = vsub.f32 %v1289_v24, %v1518_v54  ;;  %v436_v7 = vmul.f32 %v420_v15, %v420_v15  ;;  %v619_v12 = vsub.f32 %v1291_v25, %v1500_v59 }
  0xe2   : > { %v1174_v35 = vpop.eup %1173  ;;  %v731_v63 = vadd.f32 %v712_v60, %v711_v62  ;;  %v282_v6 = vmul.f32 %v1172_v16, %v250_v31  ;;  %v297_v18 = vsub.f32 2.0, %v281_v34  ;;  %v1557_v23 = vadd.f32 1.0, %v834_v48 }
  0xe3   : > { %v1176_v27 = vpop.eup %1175  ;;  %v880_v49 = vmul.f32 %v1174_v35, %v848_v36  ;;  %v1559_v20 = vadd.f32 1.0, %v835_v17  ;;  %v437_v38 = vmul.f32 %v421_v56, %v421_v56  ;;  %v1561_v10 = vadd.f32 1.0, %v436_v7 }
  0xe4   : > { %v1178_v19 = vpop.eup %1177  ;;  %732 = vadd.xlane.f32.xlu0 %v731_v63  ;;  %v298_v24 = vsub.f32 2.0, %v282_v6  ;;  %v313_v32 = vmul.f32 %v1170_v33, %v297_v18  ;;  %v881_v13 = vmul.f32 %v1176_v27, %v1522_v37  ;;  %1189 = vrcp.f32 %v1557_v23 }
  0xe5   : > { %v1180_v39 = vpop.eup %1179  ;;  %v896_v31 = vsub.f32 2.0, %v880_v49  ;;  %v482_v5 = vmul.f32 %v1178_v19, %v1524_v40  ;;  %1191 = vrcp.f32 %v1559_v20  ;;  %v453_v36 = vadd.f32 1.0, %v437_v38 }
  0xe6   : > { %v1182_v45 = vpop.eup %1181  ;;  %v314_v47 = vmul.f32 %v1172_v16, %v298_v24  ;;  %v897_v50 = vsub.f32 2.0, %v881_v13  ;;  %v483_v51 = vmul.f32 %v1180_v39, %v1528_v42  ;;  %1193 = vrcp.f32 %v1561_v10 }
  0xe7   : > { %v1184_v46 = vpop.eup %1183  ;;  %v912_v8 = vmul.f32 %v1174_v35, %v896_v31  ;;  %v498_v61 = vsub.f32 2.0, %v482_v5  ;;  %v681_v37 = vmul.f32 %v1182_v45, %v1534_v28  ;;  %1195 = vrcp.f32 %v453_v36 }
  0xe8   : > { %v335_v52 = vadd.f32 %v314_v47, %v313_v32  ;;  %v913_v9 = vmul.f32 %v1176_v27, %v897_v50  ;;  %v499_v0 = vsub.f32 2.0, %v483_v51  ;;  %v682_v40 = vmul.f32 %v1184_v46, %v650_v21 }
  0xe9   : > { %v1186_v4 = vpop.eup %1185  ;;  %v514_v41 = vmul.f32 %v1178_v19, %v498_v61  ;;  %v697_v1 = vsub.f32 2.0, %v681_v37  ;;  %v620_v58 = vsub.f32 %v1293_v26, %v1500_v59  ;;  %v635_v43 = vmul.f32 %v619_v12, %v619_v12 }
  0xea   : > { %v1188_v42 = vpop.eup %1187  ;;  %336 = vadd.xlane.f32.xlu1 %v335_v52  ;;  %v932_v2 = vadd.f32 %v913_v9, %v912_v8  ;;  %v515_v57 = vmul.f32 %v1180_v39, %v499_v0  ;;  %v698_v3 = vsub.f32 2.0, %v682_v40  ;;  %v283_v11 = vmul.f32 %v1186_v4, %v1541_v53 }
  0xeb   : > { %v713_v28 = vmul.f32 %v1182_v45, %v697_v1  ;;  %v284_v22 = vmul.f32 %v1188_v42, %v1543_v44  ;;  %v636_v55 = vmul.f32 %v620_v58, %v620_v58  ;;  %v651_v33 = vadd.f32 1.0, %v635_v43 }
  0xec   : > { %933 = vadd.xlane.f32.xlu0 %v932_v2  ;;  %v536_v21 = vadd.f32 %v515_v57, %v514_v41  ;;  %v714_v14 = vmul.f32 %v1184_v46, %v698_v3  ;;  %v299_v62 = vsub.f32 2.0, %v283_v11  ;;  %v621_v15 = vsub.f32 %v1291_v25, %v1518_v54 }
  0xed   : > { %v300_v60 = vsub.f32 2.0, %v284_v22  ;;  %v652_v34 = vadd.f32 1.0, %v636_v55  ;;  %1197 = vrcp.f32 %v651_v33  ;;  %v622_v48 = vsub.f32 %v1293_v26, %v1518_v54 }
  0xee   : > { %v1190_v16 = vpop.eup %1189  ;;  %537 = vadd.xlane.f32.xlu1 %v536_v21  ;;  %v734_v53 = vadd.f32 %v714_v14, %v713_v28  ;;  %v315_v17 = vmul.f32 %v1186_v4, %v299_v62  ;;  %v637_v44 = vmul.f32 %v621_v15, %v621_v15  ;;  %v820_v56 = vsub.f32 %v1297_v29, %v1500_v59 }
  0xef   : > { %v1192_v7 = vpop.eup %1191  ;;  %v316_v12 = vmul.f32 %v1188_v42, %v300_v60  ;;  %v882_v35 = vmul.f32 %v1190_v16, %v1557_v23  ;;  %1199 = vrcp.f32 %v652_v34  ;;  %v638_v25 = vmul.f32 %v622_v48, %v622_v48 }
  0xf0   : > { %v1194_v63 = vpop.eup %1193  ;;  %735 = vadd.xlane.f32.xlu0 %v734_v53  ;;  %v883_v6 = vmul.f32 %v1192_v7, %v1559_v20  ;;  %v653_v18 = vadd.f32 1.0, %v637_v44  ;;  %v821_v26 = vsub.f32 %v1299_v30, %v1500_v59  ;;  %v836_v27 = vmul.f32 %v820_v56, %v820_v56 }
  0xf1   : > { %v1196_v49 = vpop.eup %1195  ;;  %v338_v38 = vadd.f32 %v316_v12, %v315_v17  ;;  %v898_v19 = vsub.f32 2.0, %v882_v35  ;;  %v484_v24 = vmul.f32 %v1194_v63, %v1561_v10  ;;  %v654_v32 = vadd.f32 1.0, %v638_v25 }
  0xf2   : > { %v899_v13 = vsub.f32 2.0, %v883_v6  ;;  %v485_v39 = vmul.f32 %v1196_v49, %v453_v36  ;;  %1201 = vrcp.f32 %v653_v18  ;;  %v837_v23 = vmul.f32 %v821_v26, %v821_v26 }
  0xf3   : > { %339 = vadd.xlane.f32.xlu1 %v338_v38  ;;  %v914_v31 = vmul.f32 %v1190_v16, %v898_v19  ;;  %v500_v5 = vsub.f32 2.0, %v484_v24  ;;  %1203 = vrcp.f32 %v654_v32  ;;  %v852_v20 = vadd.f32 1.0, %v836_v27 }
  0xf4   : > { %v915_v45 = vmul.f32 %v1192_v7, %v899_v13  ;;  %v501_v47 = vsub.f32 2.0, %v485_v39  ;;  %v853_v50 = vadd.f32 1.0, %v837_v23  ;;  %v822_v59 = vsub.f32 %v1297_v29, %v1518_v54 }
  0xf5   : > { %v516_v51 = vmul.f32 %v1194_v63, %v500_v5  ;;  %1205 = vrcp.f32 %v852_v20  ;;  %v823_v10 = vsub.f32 %v1299_v30, %v1518_v54 }
  0xf6   : > { %v935_v46 = vadd.f32 %v915_v45, %v914_v31  ;;  %v517_v36 = vmul.f32 %v1196_v49, %v501_v47  ;;  %1207 = vrcp.f32 %v853_v50  ;;  %v838_v8 = vmul.f32 %v822_v59, %v822_v59 }
  0xf7   : > { %v1198_v61 = vpop.eup %1197  ;;  %v839_v37 = vmul.f32 %v823_v10, %v823_v10 }
  0xf8   : > { %936 = vadd.xlane.f32.xlu0 %v935_v46  ;;  %v539_v52 = vadd.f32 %v517_v36, %v516_v51  ;;  %v683_v9 = vmul.f32 %v1198_v61, %v651_v33  ;;  %v854_v0 = vadd.f32 1.0, %v838_v8 }
  0xf9   : > { %v1200_v40 = vpop.eup %1199  ;;  %v855_v4 = vadd.f32 1.0, %v839_v37 }
  0xfa   : > { %540 = vadd.xlane.f32.xlu1 %v539_v52  ;;  %v684_v41 = vmul.f32 %v1200_v40, %v652_v34  ;;  %v699_v29 = vsub.f32 2.0, %v683_v9  ;;  %1209 = vrcp.f32 %v854_v0 }
  0xfb   : > { %1211 = vrcp.f32 %v855_v4 }
  0xfc   : > { %v1202_v1 = vpop.eup %1201  ;;  %v700_v58 = vsub.f32 2.0, %v684_v41  ;;  %v715_v30 = vmul.f32 %v1198_v61, %v699_v29 }
  0xfd   : > { %v1204_v54 = vpop.eup %1203  ;;  %v685_v43 = vmul.f32 %v1202_v1, %v653_v18 }
  0xfe   : > { %v716_v42 = vmul.f32 %v1200_v40, %v700_v58  ;;  %v686_v2 = vmul.f32 %v1204_v54, %v654_v32 }
  0xff   : > { %v1206_v57 = vpop.eup %1205  ;;  %v701_v3 = vsub.f32 2.0, %v685_v43 }
 0x100   : > { %v1208_v11 = vpop.eup %1207  ;;  %v737_v28 = vadd.f32 %v716_v42, %v715_v30  ;;  %v702_v22 = vsub.f32 2.0, %v686_v2  ;;  %v884_v55 = vmul.f32 %v1206_v57, %v852_v20 }
 0x101   : > { %v717_v33 = vmul.f32 %v1202_v1, %v701_v3  ;;  %v885_v21 = vmul.f32 %v1208_v11, %v853_v50 }
 0x102   : > { %738 = vadd.xlane.f32.xlu0 %v737_v28  ;;  %v718_v14 = vmul.f32 %v1204_v54, %v702_v22  ;;  %v900_v62 = vsub.f32 2.0, %v884_v55 }
 0x103   : > { %v901_v15 = vsub.f32 2.0, %v885_v21 }
 0x104   : > { %v1210_v60 = vpop.eup %1209  ;;  %v740_v34 = vadd.f32 %v718_v14, %v717_v33  ;;  %v916_v48 = vmul.f32 %v1206_v57, %v900_v62 }
 0x105   : > { %v1212_v16 = vpop.eup %1211  ;;  %v917_v53 = vmul.f32 %v1208_v11, %v901_v15  ;;  %v886_v17 = vmul.f32 %v1210_v60, %v854_v0 }
 0x106   : > { %741 = vadd.xlane.f32.xlu1 %v740_v34  ;;  %v887_v44 = vmul.f32 %v1212_v16, %v855_v4 }
 0x107   : > { %v938_v56 = vadd.f32 %v917_v53, %v916_v48  ;;  %v902_v7 = vsub.f32 2.0, %v886_v17 }
 0x108   : > { %v903_v12 = vsub.f32 2.0, %v887_v44 }
 0x109   : > { %939 = vadd.xlane.f32.xlu0 %v938_v56  ;;  %v918_v35 = vmul.f32 %v1210_v60, %v902_v7 }
 0x10a   : > { %v919_v25 = vmul.f32 %v1212_v16, %v903_v12 }
 0x10c   : > { %v941_v63 = vadd.f32 %v919_v25, %v918_v35 }
 0x10e   : > { %942 = vadd.xlane.f32.xlu0 %v941_v63 }
 0x12e   : > { %v1589_v6 = vpop.xlane.xlu0 %318 }
 0x12f   : > { %v350_v46 = vsel %vm349_vm0, %v1589_v6, 0.0 }
 0x132   : > { %v1591_v18 = vpop.xlane.xlu1 %321  ;;  %v1593_v26 = vpop.xlane.xlu0 %519 }
 0x133   : > { %v351_v10 = vsel %vm349_vm0, %v1591_v18, 0.0  ;;  %v550_v1 = vsel %vm349_vm0, %v1593_v26, 0.0 }
 0x134   : > { %v352_v8 = vadd.f32 %v351_v10, %v350_v46 }
 0x136   : > { %v1595_v27 = vpop.xlane.xlu1 %324  ;;  %v1597_v49 = vpop.xlane.xlu0 %522 }
 0x137   : > { %v353_v36 = vsel %vm349_vm0, %v1595_v27, 0.0  ;;  %v551_v40 = vsel %vm349_vm0, %v1597_v49, 0.0 }
 0x138   : > { %v354_v9 = vadd.f32 %v353_v36, %v352_v8  ;;  %v552_v54 = vadd.f32 %v551_v40, %v550_v1 }
 0x13a   : > { %v1599_v38 = vpop.xlane.xlu1 %723  ;;  %v1601_v19 = vpop.xlane.xlu0 %720 }
 0x13b   : > { %v752_v48 = vsel %vm349_vm0, %v1599_v38, 0.0  ;;  %v751_v16 = vsel %vm349_vm0, %v1601_v19, 0.0 }
 0x13c   : > { %v753_v7 = vadd.f32 %v752_v48, %v751_v16 }
 0x13e   : > { %v1603_v24 = vpop.xlane.xlu1 %921  ;;  %v1605_v32 = vpop.xlane.xlu0 %525 }
 0x13f   : > { %v553_v58 = vsel %vm349_vm0, %v1605_v32, 0.0 }
 0x140   : > { %v554_v3 = vadd.f32 %v553_v58, %v552_v54 }
 0x142   : > { %v1607_v13 = vpop.xlane.xlu1 %327 }
 0x143   : > { %v355_v61 = vsel %vm349_vm0, %v1607_v13, 0.0 }
 0x144   : > { %v356_v4 = vadd.f32 %v355_v61, %v354_v9 }
 0x14c   : > { %v1609_v39 = vpop.xlane.xlu0 %924 }
 0x14d   : > { %v953_v36 = vsel %vm349_vm0, %v1609_v39, 0.0 }
 0x152   : > { %v1611_v23 = vpop.xlane.xlu1 %528 }
 0x153   : > { %v555_v2 = vsel %vm349_vm0, %v1611_v23, 0.0 }
 0x154   : > { %v556_v55 = vadd.f32 %v555_v2, %v554_v3 }
 0x155   : > { %v1613_v31 = vpop.xlane.xlu0 %726 }
 0x156   : > { %v754_v44 = vsel %vm349_vm0, %v1613_v31, 0.0 }
 0x157   : > { %v1615_v5 = vpop.xlane.xlu1 %330  ;;  %v755_v63 = vadd.f32 %v754_v44, %v753_v7 }
 0x158   : > { %v357_v0 = vsel %vm349_vm0, %v1615_v5, 0.0 }
 0x159   : > { %v1617_v20 = vpop.xlane.xlu0 %927  ;;  %v358_v30 = vadd.f32 %v357_v0, %v356_v4  ;;  %v952_v0 = vsel %vm349_vm0, %v1603_v24, 0.0 }
 0x15a   : > { %v955_v40 = vsel %vm349_vm0, %v1617_v20, 0.0 }
 0x15b   : > { %v1619_v45 = vpop.xlane.xlu1 %531 }
 0x15c   : > { %v557_v11 = vsel %vm349_vm0, %v1619_v45, 0.0 }
 0x15d   : > { %v558_v62 = vadd.f32 %v557_v11, %v556_v55 }
 0x15f   : > { %v1621_v47 = vpop.xlane.xlu0 %729 }
 0x160   : > { %v756_v25 = vsel %vm349_vm0, %v1621_v47, 0.0 }
 0x161   : > { %v1623_v50 = vpop.xlane.xlu1 %333  ;;  %v757_v46 = vadd.f32 %v756_v25, %v755_v63 }
 0x162   : > { %v359_v41 = vsel %vm349_vm0, %v1623_v50, 0.0 }
 0x163   : > { %v360_v57 = vadd.f32 %v359_v41, %v358_v30  ;;  %v954_v41 = vadd.f32 %v953_v36, %v952_v0 }
 0x165   : > { %v1625_v59 = vpop.xlane.xlu0 %930  ;;  %v956_v30 = vadd.f32 %v955_v40, %v954_v41 }
 0x166   : > { %v957_v58 = vsel %vm349_vm0, %v1625_v59, 0.0 }
 0x167   : > { %v958_v3 = vadd.f32 %v957_v58, %v956_v30 }
 0x16e   : > { %v1627_v51 = vpop.xlane.xlu1 %534 }
 0x16f   : > { %v559_v21 = vsel %vm349_vm0, %v1627_v51, 0.0 }
 0x170   : > { %v560_v34 = vadd.f32 %v559_v21, %v558_v62 }
 0x171   : > { %v1637_v37 = vpop.xlane.xlu0 %732 }
 0x172   : > { %v758_v10 = vsel %vm349_vm0, %v1637_v37, 0.0 }
 0x173   : > { %v759_v61 = vadd.f32 %v758_v10, %v757_v46 }
 0x177   : > { %v1639_v52 = vpop.xlane.xlu1 %336 }
 0x178   : > { %v361_v43 = vsel %vm349_vm0, %v1639_v52, 0.0 }
 0x179   : > { %v1655_v42 = vpop.xlane.xlu0 %933  ;;  %v362_v28 = vadd.f32 %v361_v43, %v360_v57 }
 0x17a   : > { %v959_v2 = vsel %vm349_vm0, %v1655_v42, 0.0 }
 0x17b   : > { %v1647_v29 = vpop.xlane.xlu1 %537 }
 0x17c   : > { %v561_v60 = vsel %vm349_vm0, %v1647_v29, 0.0 }
 0x17d   : > { %v1667_v15 = vpop.xlane.xlu0 %735  ;;  %v562_v53 = vadd.f32 %v561_v60, %v560_v34 }
 0x17e   : > { %v760_v8 = vsel %vm349_vm0, %v1667_v15, 0.0 }
 0x17f   : > { %v761_v1 = vadd.f32 %v760_v8, %v759_v61 }
 0x180   : > { %v1661_v22 = vpop.xlane.xlu1 %339 }
 0x181   : > { %v363_v33 = vsel %vm349_vm0, %v1661_v22, 0.0 }
 0x182   : > { %v364_v14 = vadd.f32 %v363_v33, %v362_v28  ;;  %v960_v33 = vadd.f32 %v959_v2, %v958_v3 }
 0x184   : > { %365 = vadd.xlane.f32.xlu1 %v364_v14 }
 0x185   : > { %v1681_v12 = vpop.xlane.xlu0 %936 }
 0x186   : > { %v961_v28 = vsel %vm349_vm0, %v1681_v12, 0.0 }
 0x187   : > { %v1675_v17 = vpop.xlane.xlu1 %540  ;;  %v962_v14 = vadd.f32 %v961_v28, %v960_v33 }
 0x188   : > { %v563_v56 = vsel %vm349_vm0, %v1675_v17, 0.0 }
 0x189   : > { %v564_v35 = vadd.f32 %v563_v56, %v562_v53 }
 0x18b   : > { %565 = vadd.xlane.f32.xlu0 %v564_v35 }
 0x18f   : > { %v1691_v9 = vpop.xlane.xlu0 %738 }
 0x190   : > { %v762_v4 = vsel %vm349_vm0, %v1691_v9, 0.0 }
 0x191   : > { %v763_v54 = vadd.f32 %v762_v4, %v761_v1 }
 0x193   : > { %v1701_v43 = vpop.xlane.xlu1 %741 }
 0x194   : > { %v764_v57 = vsel %vm349_vm0, %v1701_v43, 0.0 }
 0x195   : > { %v765_v11 = vadd.f32 %v764_v57, %v763_v54 }
 0x196   : > { %v1709_v55 = vpop.xlane.xlu0 %939 }
 0x197   : > { %766 = vadd.xlane.f32.xlu1 %v765_v11  ;;  %v963_v21 = vsel %vm349_vm0, %v1709_v55, 0.0 }
 0x198   : > { %v964_v62 = vadd.f32 %v963_v21, %v962_v14 }
 0x19b   : > { %v1713_v60 = vpop.xlane.xlu0 %942 }
 0x19c   : > { %v965_v34 = vsel %vm349_vm0, %v1713_v60, 0.0 }
 0x19d   : > { %v966_v48 = vadd.f32 %v965_v34, %v964_v62 }
 0x19f   : > { %967 = vadd.xlane.f32.xlu0 %v966_v48 }
 0x211   : > { %v366_v16 = vpop.xlane.xlu1 %365 }
 0x212   : > { %v367_v53 = vrot.slane %v366_v16, 4 }
 0x214   : > { %v368_v44 = vadd.f32 %v367_v53, %v366_v16 }
 0x216   : > { %v369_v56 = vrot.slane %v368_v44, 2 }
 0x218   : > { %v566_v7 = vpop.xlane.xlu0 %565  ;;  %v370_v35 = vadd.f32 %v369_v56, %v368_v44 }
 0x219   : > { %v567_v25 = vrot.slane %v566_v7, 4 }
 0x21a   : > { %v371_v63 = vrot.slane %v370_v35, 1 }
 0x21b   : > { %v568_v10 = vadd.f32 %v567_v25, %v566_v7 }
 0x21c   : > { %v372_v46 = vadd.f32 %v371_v63, %v370_v35 }
 0x21d   : > { %v569_v36 = vrot.slane %v568_v10, 2 }
 0x21e   : > { %1066 = vpush %v372_v46 }
 0x21f   : > { %v570_v8 = vadd.f32 %v569_v36, %v568_v10 }
 0x221   : > { %v571_v61 = vrot.slane %v570_v8, 1 }
 0x223   : > { %v572_v0 = vadd.f32 %v571_v61, %v570_v8 }
 0x224   : > { %v767_v40 = vpop.xlane.xlu1 %766 }
 0x225   : > { %v768_v4 = vrot.slane %v767_v40, 4  ;;  %1068 = vpush %v572_v0 }
 0x227   : > { %v769_v41 = vadd.f32 %v768_v4, %v767_v40 }
 0x229   : > { %v770_v1 = vrot.slane %v769_v41, 2 }
 0x22b   : > { %v771_v58 = vadd.f32 %v770_v1, %v769_v41 }
 0x22c   : > { %v968_v30 = vpop.xlane.xlu0 %967 }
 0x22d   : > { %v969_v54 = vrot.slane %v968_v30, 4  ;;  %v772_v2 = vrot.slane %v771_v58, 1 }
 0x22f   : > { %v970_v57 = vadd.f32 %v969_v54, %v968_v30  ;;  %v773_v3 = vadd.f32 %v772_v2, %v771_v58 }
 0x231   : > { %v971_v11 = vrot.slane %v970_v57, 2  ;;  %1070 = vpush %v773_v3 }
 0x233   : > { %v972_v28 = vadd.f32 %v971_v11, %v970_v57 }
 0x235   : > { %v973_v33 = vrot.slane %v972_v28, 1 }
 0x237   : > { %v974_v21 = vadd.f32 %v973_v33, %v972_v28 }
 0x239   : > { %1072 = vpush %v974_v21 }
 0x24f   : > { %s1067_s3 = spop %1066 }
 0x250   : > { %v374_v14 = vstv %s1067_s3 }
 0x251   : > { %1213 = vrcp.f32 %v374_v14 }
 0x256   : > { %s1069_s4 = spop %1068 }
 0x257   : > { %v574_v62 = vstv %s1069_s4 }
 0x258   : > { %1215 = vrcp.f32 %v574_v62 }
 0x25b   : > { %v1214_v34 = vpop.eup %1213 }
 0x25c   : > { %v376_v48 = vmul.f32 %v1214_v34, %v1589_v6  ;;  %v377_v16 = vmul.f32 %v1214_v34, %v1591_v18  ;;  %v378_v53 = vmul.f32 %v1214_v34, %v1595_v27  ;;  %v379_v44 = vmul.f32 %v1214_v34, %v1607_v13 }
 0x25d   : > { %v380_v56 = vmul.f32 %v1214_v34, %v1615_v5  ;;  %v381_v7 = vmul.f32 %v1214_v34, %v1623_v50  ;;  %v382_v35 = vmul.f32 %v1214_v34, %v1639_v52  ;;  %v383_v25 = vmul.f32 %v1214_v34, %v1661_v22 }
 0x25e   : > { %384 = vst.msk [vmem:[%s1721_s8] sm:$0xff] %vm349_vm0, %v376_v48  ;;  %385 = vst.msk [vmem:[%s1721_s8 + $0x8] sm:$0xff] %vm349_vm0, %v377_v16 }
 0x25f   : > { %386 = vst.msk [vmem:[%s1721_s8 + $0x10] sm:$0xff] %vm349_vm0, %v378_v53  ;;  %387 = vst.msk [vmem:[%s1721_s8 + $0x18] sm:$0xff] %vm349_vm0, %v379_v44 }
 0x260   : > { %388 = vst.msk [vmem:[%s1721_s8 + $0x20] sm:$0xff] %vm349_vm0, %v380_v56  ;;  %389 = vst.msk [vmem:[%s1721_s8 + $0x28] sm:$0xff] %vm349_vm0, %v381_v7 }
 0x261   : > { %390 = vst.msk [vmem:[%s1721_s8 + $0x30] sm:$0xff] %vm349_vm0, %v382_v35  ;;  %391 = vst.msk [vmem:[%s1721_s8 + $0x38] sm:$0xff] %vm349_vm0, %v383_v25 }
 0x262   : > { %v1216_v6 = vpop.eup %1215  ;;  %s1071_s10 = spop %1070 }
 0x263   : > { %v576_v18 = vmul.f32 %v1216_v6, %v1593_v26  ;;  %v577_v27 = vmul.f32 %v1216_v6, %v1597_v49  ;;  %v578_v13 = vmul.f32 %v1216_v6, %v1605_v32  ;;  %v579_v5 = vmul.f32 %v1216_v6, %v1611_v23 }
 0x264   : > { %v580_v50 = vmul.f32 %v1216_v6, %v1619_v45  ;;  %v581_v52 = vmul.f32 %v1216_v6, %v1627_v51  ;;  %v582_v22 = vmul.f32 %v1216_v6, %v1647_v29  ;;  %v583_v63 = vmul.f32 %v1216_v6, %v1675_v17 }
 0x265   : > { %585 = vst.msk [vmem:[%s1721_s8] sm:$0xff] %vm584_vm1, %v576_v18  ;;  %586 = vst.msk [vmem:[%s1721_s8 + $0x8] sm:$0xff] %vm584_vm1, %v577_v27  ;;  %v775_v26 = vstv %s1071_s10 }
 0x266   : > { %587 = vst.msk [vmem:[%s1721_s8 + $0x10] sm:$0xff] %vm584_vm1, %v578_v13  ;;  %588 = vst.msk [vmem:[%s1721_s8 + $0x18] sm:$0xff] %vm584_vm1, %v579_v5  ;;  %1217 = vrcp.f32 %v775_v26 }
 0x267   : > { %589 = vst.msk [vmem:[%s1721_s8 + $0x20] sm:$0xff] %vm584_vm1, %v580_v50  ;;  %590 = vst.msk [vmem:[%s1721_s8 + $0x28] sm:$0xff] %vm584_vm1, %v581_v52 }
 0x268   : > { %591 = vst.msk [vmem:[%s1721_s8 + $0x30] sm:$0xff] %vm584_vm1, %v582_v22  ;;  %592 = vst.msk [vmem:[%s1721_s8 + $0x38] sm:$0xff] %vm584_vm1, %v583_v63 }
 0x26a   : > { %s1073_s11 = spop %1072 }
 0x26b   : > { %v976_v49 = vstv %s1073_s11 }
 0x26c   : > { %1219 = vrcp.f32 %v976_v49 }
 0x270   : > { %v1218_v32 = vpop.eup %1217 }
 0x271   : > { %v777_v23 = vmul.f32 %v1218_v32, %v1601_v19  ;;  %v778_v45 = vmul.f32 %v1218_v32, %v1599_v38  ;;  %v779_v51 = vmul.f32 %v1218_v32, %v1613_v31  ;;  %v780_v29 = vmul.f32 %v1218_v32, %v1621_v47 }
 0x272   : > { %v781_v17 = vmul.f32 %v1218_v32, %v1637_v37  ;;  %v782_v10 = vmul.f32 %v1218_v32, %v1667_v15  ;;  %v783_v46 = vmul.f32 %v1218_v32, %v1691_v9  ;;  %v784_v36 = vmul.f32 %v1218_v32, %v1701_v43 }
 0x273   : > { %786 = vst.msk [vmem:[%s1721_s8] sm:$0xff] %vm785_vm2, %v777_v23  ;;  %787 = vst.msk [vmem:[%s1721_s8 + $0x8] sm:$0xff] %vm785_vm2, %v778_v45 }
 0x274   : > { %788 = vst.msk [vmem:[%s1721_s8 + $0x10] sm:$0xff] %vm785_vm2, %v779_v51  ;;  %789 = vst.msk [vmem:[%s1721_s8 + $0x18] sm:$0xff] %vm785_vm2, %v780_v29 }
 0x275   : > { %790 = vst.msk [vmem:[%s1721_s8 + $0x20] sm:$0xff] %vm785_vm2, %v781_v17  ;;  %791 = vst.msk [vmem:[%s1721_s8 + $0x28] sm:$0xff] %vm785_vm2, %v782_v10 }
 0x276   : > { %792 = vst.msk [vmem:[%s1721_s8 + $0x30] sm:$0xff] %vm785_vm2, %v783_v46  ;;  %793 = vst.msk [vmem:[%s1721_s8 + $0x38] sm:$0xff] %vm785_vm2, %v784_v36  ;;  %v1220_v38 = vpop.eup %1219 }
 0x277   : > { %v978_v19 = vmul.f32 %v1220_v38, %v1603_v24  ;;  %v979_v31 = vmul.f32 %v1220_v38, %v1609_v39  ;;  %v980_v47 = vmul.f32 %v1220_v38, %v1617_v20  ;;  %v981_v37 = vmul.f32 %v1220_v38, %v1625_v59 }
 0x278   : > { %v982_v15 = vmul.f32 %v1220_v38, %v1655_v42  ;;  %v983_v9 = vmul.f32 %v1220_v38, %v1681_v12  ;;  %v984_v43 = vmul.f32 %v1220_v38, %v1709_v55  ;;  %v985_v8 = vmul.f32 %v1220_v38, %v1713_v60 }
 0x279   : > { %987 = vst.msk [vmem:[%s1721_s8] sm:$0xff] %vm986_vm3, %v978_v19  ;;  %988 = vst.msk [vmem:[%s1721_s8 + $0x8] sm:$0xff] %vm986_vm3, %v979_v31 }
 0x27a   : > { %989 = vst.msk [vmem:[%s1721_s8 + $0x10] sm:$0xff] %vm986_vm3, %v980_v47  ;;  %990 = vst.msk [vmem:[%s1721_s8 + $0x18] sm:$0xff] %vm986_vm3, %v981_v37 }
 0x27b   : > { %991 = vst.msk [vmem:[%s1721_s8 + $0x20] sm:$0xff] %vm986_vm3, %v982_v15  ;;  %992 = vst.msk [vmem:[%s1721_s8 + $0x28] sm:$0xff] %vm986_vm3, %v983_v9 }
 0x27c   : > { %993 = vst.msk [vmem:[%s1721_s8 + $0x30] sm:$0xff] %vm986_vm3, %v984_v43  ;;  %994 = vst.msk [vmem:[%s1721_s8 + $0x38] sm:$0xff] %vm986_vm3, %v985_v8 }
 0x27d PF: > { %s12_s9 = sadd.s32 1, %s1227_s9  }
 0x27e   : > { %p9_p4 = scmp.ge.s32.totalorder %s12_s9, 4  }
 0x280   :  { %11 = sbr.rel (!%p9_p4) target bundleno = 1 (0x1), region = 61 }

</bundles_post_ra>
